<compile_context>
chip_gen: v7x
topology: tpu7x:2x2x1
jax: 0.10.0
libtpu: 0.0.40
codegen_flags: <defaults>
</compile_context>

<pallas_src>
import jax
import jax.numpy as jnp
from jax.experimental import pallas as pl
from jax.experimental.pallas import tpu as pltpu


def _round_up(v: int, m: int) -> int:
    return (v + m - 1) // m * m


def _pad2(a, rows: int, cols: int):
    out = jnp.zeros((rows, cols), a.dtype)
    return out.at[: a.shape[0], : a.shape[1]].set(a)


# ---------------------------------------------------------------------------
# Fused Pallas kernel: ALL GIN layers in one pallas_call.
# ---------------------------------------------------------------------------
def _make_fused_kernel(num_layers: int):
    def kernel(x_ref, g_ref, s_ref, ee_ref,
               w1_ref, b1_ref, w2_ref, b2_ref,
               eps_ref, out_ref):
        # One-hot gather/scatter matrices are bf16 (0/1 is exact); cast once to
        # f32 so the MXU dots accumulate in f32 exactly like the reference.
        g = g_ref[...].astype(jnp.float32)          # [E, N]  (x_j = g @ h)
        s = s_ref[...].astype(jnp.float32)          # [N, E]  (agg = s @ msg)

        h = x_ref[...]                              # [N, DP]; stays in VMEM across layers

        for l in range(num_layers):                 # short fixed count -> fully unrolled
            # gather x_j = x[src]  (dense one-hot matmul on the MXU)
            xj = jnp.dot(g, h, preferred_element_type=jnp.float32)      # [E, DP]
            # edge embeddings were precomputed in the wrapper (h-independent)
            msg = jnp.maximum(xj + ee_ref[l], 0.0)  # relu(x_j + edge_emb)

            # scatter-add at dst
            agg = jnp.dot(s, msg, preferred_element_type=jnp.float32)   # [N, DP]

            # (1 + eps) * x + agg ; eps read as a scalar from SMEM
            h = (1.0 + eps_ref[l]) * h + agg

            # mlp: Linear -> BN(folded into weights) -> ReLU -> Linear,
            # then outer BN (also folded into w2/b2).
            h = jnp.dot(h, w1_ref[l], preferred_element_type=jnp.float32) + b1_ref[l]
            h = jnp.maximum(h, 0.0)
            h = jnp.dot(h, w2_ref[l], preferred_element_type=jnp.float32) + b2_ref[l]

            if l != num_layers - 1:                 # relu for all but the last layer
                h = jnp.maximum(h, 0.0)
            # dropout: identity in eval mode

        # NOTE: padded node rows carry relu(b1/b2) garbage; the padded weight /
        # bias rows+cols are exactly zero by construction of _pad2, and the
        # padded node rows are sliced off in the wrapper.
        out_ref[...] = h

    return kernel


# ---------------------------------------------------------------------------
# Wrapper: fold BN, precompute edge embeddings, pad, single fused pallas_call.
# ---------------------------------------------------------------------------
def custom_gin_forward_pallas(x, edge_index, edge_attr, layer_params, hidden_dim):
    src, dst = edge_index[0], edge_index[1]
    n, d_in = x.shape
    e = src.shape[0]
    num_layers = len(layer_params)

    d_pad = _round_up(max(d_in, hidden_dim), 8)     # NO padding to 128 (perf review)
    n_pad = _round_up(n, 8)                         # sublane-aligned
    e_pad = _round_up(e, 8)

    x_pad = jnp.zeros((n_pad, d_pad), jnp.float32).at[:n, :d_in].set(x)

    # One-hot gather [E,N] / scatter [N,E] matrices; 0/1 values are exact in bf16.
    gmat = jnp.zeros((e_pad, n_pad), jnp.float32).at[jnp.arange(e), src].set(1.0)
    smat = jnp.zeros((n_pad, e_pad), jnp.float32).at[dst, jnp.arange(e)].set(1.0)
    gmat = gmat.astype(jnp.bfloat16)
    smat = smat.astype(jnp.bfloat16)

    # Precompute bond-encoder edge embeddings (h-independent) in plain XLA,
    # fold eval-mode BN scale/shift into adjacent Linear weights, pad, stack.
    ee_l, w1_l, b1_l, w2_l, b2_l, eps_l = [], [], [], [], [], []
    for p in layer_params:
        ee = edge_attr @ p["wb"] + p["bb"]          # [E, d_in_layer]
        w1f = p["w1"] * p["s1"]
        b1f = p["b1"] * p["s1"] + p["t1"]
        w2f = p["w2"] * p["s2"]
        b2f = p["b2"] * p["s2"] + p["t2"]
        ee_l.append(_pad2(ee, e_pad, d_pad))
        w1_l.append(_pad2(w1f, d_pad, d_pad))
        b1_l.append(_pad2(b1f, 1, d_pad))
        w2_l.append(_pad2(w2f, d_pad, d_pad))
        b2_l.append(_pad2(b2f, 1, d_pad))
        eps_l.append(p["eps"][0, 0])
    ee = jnp.stack(ee_l)                            # [L, E_pad, DP]
    w1 = jnp.stack(w1_l)                            # [L, DP, DP]
    b1 = jnp.stack(b1_l)                            # [L, 1, DP]
    w2 = jnp.stack(w2_l)                            # [L, DP, DP]
    b2 = jnp.stack(b2_l)                            # [L, 1, DP]
    eps = jnp.stack(eps_l).astype(jnp.float32)      # [L] -> SMEM scalars

    vmem = pl.BlockSpec(memory_space=pltpu.MemorySpace.VMEM)
    smem = pl.BlockSpec(memory_space=pltpu.MemorySpace.SMEM)

    # Advisory cost estimate so XLA schedules neighbouring ops around the call.
    mm_flops = 2 * num_layers * (e_pad * n_pad * d_pad          # gather
                                 + n_pad * e_pad * d_pad        # scatter
                                 + 2 * n_pad * d_pad * d_pad)   # two MLP linears
    in_bytes = sum(int(a.size) * a.dtype.itemsize
                   for a in (x_pad, gmat, smat, ee, w1, b1, w2, b2, eps))
    out_bytes = n_pad * d_pad * 4
    cost = pl.CostEstimate(flops=mm_flops, transcendentals=0,
                           bytes_accessed=in_bytes + out_bytes)

    out = pl.pallas_call(
        _make_fused_kernel(num_layers),
        out_shape=jax.ShapeDtypeStruct((n_pad, d_pad), jnp.float32),
        in_specs=[vmem, vmem, vmem, vmem,           # x, gmat, smat, ee
                  vmem, vmem, vmem, vmem,           # stacked per-layer weights/biases
                  smem],                            # eps scalars
        out_specs=vmem,
        cost_estimate=cost,
    )(x_pad, gmat, smat, ee, w1, b1, w2, b2, eps)

    return out[:n, :hidden_dim]                     # strip padding


# ---------------------------------------------------------------------------
# Plain-JAX reference (unfolded, unpadded) for correctness check
# ---------------------------------------------------------------------------
def custom_gin_forward_ref(x, edge_index, edge_attr, layer_params):
    src, dst = edge_index[0], edge_index[1]
    num_layers = len(layer_params)
    h = x
    for layer, p in enumerate(layer_params):
        ee = edge_attr @ p["wb"] + p["bb"]
        msg = jnp.maximum(h[src] + ee, 0.0)
        agg = jnp.zeros_like(h).at[dst].add(msg)
        h = (1.0 + p["eps"][0, 0]) * h + agg
        h = h @ p["w1"] + p["b1"]
        h = h * p["s1"] + p["t1"]
        h = jnp.maximum(h, 0.0)
        h = h @ p["w2"] + p["b2"]
        h = h * p["s2"] + p["t2"]
        if layer != num_layers - 1:
            h = jnp.maximum(h, 0.0)
    return h


# ---------------------------------------------------------------------------
# Deterministic parameter construction
# ---------------------------------------------------------------------------
def _linear(key, d_in, d_out):
    kw, kb = jax.random.split(key)
    bound = 1.0 / jnp.sqrt(d_in)
    w = jax.random.uniform(kw, (d_in, d_out), jnp.float32, -bound, bound)
    b = jax.random.uniform(kb, (1, d_out), jnp.float32, -bound, bound)
    return w, b


def _bn_folded(key, d):
    kg, kb, km, kv = jax.random.split(key, 4)
    gamma = 1.0 + 0.1 * jax.random.normal(kg, (1, d), jnp.float32)
    beta = 0.1 * jax.random.normal(kb, (1, d), jnp.float32)
    rmean = 0.1 * jax.random.normal(km, (1, d), jnp.float32)
    rvar = jnp.abs(jax.random.normal(kv, (1, d), jnp.float32)) + 0.5
    scale = gamma / jnp.sqrt(rvar + 1e-5)
    shift = beta - rmean * scale
    return scale, shift


def make_layer_params(key, d_in, hidden):
    k = jax.random.split(key, 4)
    wb, bb = _linear(k[0], 3, d_in)            # bond_encoder: Linear(3, d_in)
    w1, b1 = _linear(k[1], d_in, hidden)       # mlp Linear 1
    s1, t1 = _bn_folded(k[2], hidden)          # mlp BatchNorm1d (eval, folded)
    w2, b2 = _linear(k[3], hidden, hidden)     # mlp Linear 2
    s2, t2 = _bn_folded(jax.random.fold_in(key, 99), hidden)  # outer BatchNorm1d
    eps = jnp.zeros((1, 1), jnp.float32)       # nn.Parameter(torch.Tensor([0]))
    return dict(wb=wb, bb=bb, eps=eps, w1=w1, b1=b1, s1=s1, t1=t1,
                w2=w2, b2=b2, s2=s2, t2=t2)


# ---------------------------------------------------------------------------
# Main
# ---------------------------------------------------------------------------
if __name__ == "__main__":
    num_layer = 2
    input_dim = 8
    hidden_dim = 32
    num_nodes = 16
    num_edges = 32

    root = jax.random.PRNGKey(0)
    k_x, k_ea, k_src, k_dst, k_p = jax.random.split(root, 5)

    x = jax.random.normal(k_x, (num_nodes, input_dim), jnp.float32)
    edge_attr = jax.random.normal(k_ea, (num_edges, 3), jnp.float32)
    src = jax.random.randint(k_src, (num_edges,), 0, num_nodes)
    dst = jax.random.randint(k_dst, (num_edges,), 0, num_nodes)
    edge_index = jnp.stack([src, dst], axis=0)

    layer_params = []
    keys = jax.random.split(k_p, num_layer)
    for layer in range(num_layer):
        d_in = input_dim if layer == 0 else hidden_dim
        layer_params.append(make_layer_params(keys[layer], d_in, hidden_dim))

    out = custom_gin_forward_pallas(x, edge_index, edge_attr, layer_params, hidden_dim)
    out = jax.block_until_ready(out)

    ref = custom_gin_forward_ref(x, edge_index, edge_attr, layer_params)
    ref = jax.block_until_ready(ref)

    assert out.shape == (num_nodes, hidden_dim)
    assert jnp.allclose(out, ref, rtol=5e-4, atol=5e-4), "mismatch vs JAX reference"

    print("KERNEL_OK")
</pallas_src>

<mosaic_0001>
module attributes {stable_mosaic.version = 11 : i64} {
  func.func @kernel(%arg0: memref<16x32xf32, #tpu.memory_space<vmem>>, %arg1: memref<32x16xbf16, #tpu.memory_space<vmem>>, %arg2: memref<16x32xbf16, #tpu.memory_space<vmem>>, %arg3: memref<2x32x32xf32, #tpu.memory_space<vmem>>, %arg4: memref<2x32x32xf32, #tpu.memory_space<vmem>>, %arg5: memref<2x1x32xf32, #tpu.memory_space<vmem>>, %arg6: memref<2x32x32xf32, #tpu.memory_space<vmem>>, %arg7: memref<2x1x32xf32, #tpu.memory_space<vmem>>, %arg8: memref<2xf32, #tpu.memory_space<smem>>, %arg9: memref<16x32xf32, #tpu.memory_space<vmem>>) attributes {dimension_semantics = [], scalar_prefetch = 0 : i64, scratch_operands = 0 : i64, tpu.core_type = #tpu.core_type<tc>} {
    %c0 = arith.constant 0 : index
    %c0_0 = arith.constant 0 : index
    %0 = vector.load %arg1[%c0, %c0_0] : memref<32x16xbf16, #tpu.memory_space<vmem>>, vector<32x16xbf16>
    %1 = arith.extf %0 : vector<32x16xbf16> to vector<32x16xf32>
    %c0_1 = arith.constant 0 : index
    %c0_2 = arith.constant 0 : index
    %2 = vector.load %arg2[%c0_1, %c0_2] : memref<16x32xbf16, #tpu.memory_space<vmem>>, vector<16x32xbf16>
    %3 = arith.extf %2 : vector<16x32xbf16> to vector<16x32xf32>
    %c0_3 = arith.constant 0 : index
    %c0_4 = arith.constant 0 : index
    %4 = vector.load %arg0[%c0_3, %c0_4] : memref<16x32xf32, #tpu.memory_space<vmem>>, vector<16x32xf32>
    %cst = arith.constant dense<0.000000e+00> : vector<32x32xf32>
    %5 = tpu.matmul %1, %4, %cst {dimension_numbers = #tpu.dot_dimension_numbers<[1], [0], [0], [1], [0, 0, 1, 1], [], []>} : vector<32x16xf32>, vector<16x32xf32>, vector<32x32xf32> -> vector<32x32xf32>
    %c0_5 = arith.constant 0 : index
    %c0_6 = arith.constant 0 : index
    %c0_7 = arith.constant 0 : index
    %6 = vector.load %arg3[%c0_5, %c0_6, %c0_7] : memref<2x32x32xf32, #tpu.memory_space<vmem>>, vector<1x32x32xf32>
    %7 = vector.shape_cast %6 : vector<1x32x32xf32> to vector<32x32xf32>
    %8 = arith.addf %5, %7 : vector<32x32xf32>
    %cst_8 = arith.constant 0.000000e+00 : f32
    %9 = vector.broadcast %cst_8 : f32 to vector<32x32xf32>
    %10 = arith.maximumf %8, %9 : vector<32x32xf32>
    %cst_9 = arith.constant dense<0.000000e+00> : vector<16x32xf32>
    %11 = tpu.matmul %3, %10, %cst_9 {dimension_numbers = #tpu.dot_dimension_numbers<[1], [0], [0], [1], [0, 0, 1, 1], [], []>} : vector<16x32xf32>, vector<32x32xf32>, vector<16x32xf32> -> vector<16x32xf32>
    %c0_10 = arith.constant 0 : index
    %12 = memref.load %arg8[%c0_10] : memref<2xf32, #tpu.memory_space<smem>>
    %cst_11 = arith.constant 1.000000e+00 : f32
    %13 = arith.addf %cst_11, %12 : f32
    %14 = vector.broadcast %13 : f32 to vector<16x32xf32>
    %15 = arith.mulf %14, %4 : vector<16x32xf32>
    %16 = arith.addf %15, %11 : vector<16x32xf32>
    %c0_12 = arith.constant 0 : index
    %c0_13 = arith.constant 0 : index
    %c0_14 = arith.constant 0 : index
    %17 = vector.load %arg4[%c0_12, %c0_13, %c0_14] : memref<2x32x32xf32, #tpu.memory_space<vmem>>, vector<1x32x32xf32>
    %18 = vector.shape_cast %17 : vector<1x32x32xf32> to vector<32x32xf32>
    %cst_15 = arith.constant dense<0.000000e+00> : vector<16x32xf32>
    %19 = tpu.matmul %16, %18, %cst_15 {dimension_numbers = #tpu.dot_dimension_numbers<[1], [0], [0], [1], [0, 0, 1, 1], [], []>} : vector<16x32xf32>, vector<32x32xf32>, vector<16x32xf32> -> vector<16x32xf32>
    %c0_16 = arith.constant 0 : index
    %c0_17 = arith.constant 0 : index
    %c0_18 = arith.constant 0 : index
    %20 = vector.load %arg5[%c0_16, %c0_17, %c0_18] : memref<2x1x32xf32, #tpu.memory_space<vmem>>, vector<1x1x32xf32>
    %21 = vector.shape_cast %20 : vector<1x1x32xf32> to vector<1x32xf32>
    %22 = vector.broadcast %21 : vector<1x32xf32> to vector<16x32xf32>
    %23 = arith.addf %19, %22 : vector<16x32xf32>
    %cst_19 = arith.constant 0.000000e+00 : f32
    %24 = vector.broadcast %cst_19 : f32 to vector<16x32xf32>
    %25 = arith.maximumf %23, %24 : vector<16x32xf32>
    %c0_20 = arith.constant 0 : index
    %c0_21 = arith.constant 0 : index
    %c0_22 = arith.constant 0 : index
    %26 = vector.load %arg6[%c0_20, %c0_21, %c0_22] : memref<2x32x32xf32, #tpu.memory_space<vmem>>, vector<1x32x32xf32>
    %27 = vector.shape_cast %26 : vector<1x32x32xf32> to vector<32x32xf32>
    %cst_23 = arith.constant dense<0.000000e+00> : vector<16x32xf32>
    %28 = tpu.matmul %25, %27, %cst_23 {dimension_numbers = #tpu.dot_dimension_numbers<[1], [0], [0], [1], [0, 0, 1, 1], [], []>} : vector<16x32xf32>, vector<32x32xf32>, vector<16x32xf32> -> vector<16x32xf32>
    %c0_24 = arith.constant 0 : index
    %c0_25 = arith.constant 0 : index
    %c0_26 = arith.constant 0 : index
    %29 = vector.load %arg7[%c0_24, %c0_25, %c0_26] : memref<2x1x32xf32, #tpu.memory_space<vmem>>, vector<1x1x32xf32>
    %30 = vector.shape_cast %29 : vector<1x1x32xf32> to vector<1x32xf32>
    %31 = vector.broadcast %30 : vector<1x32xf32> to vector<16x32xf32>
    %32 = arith.addf %28, %31 : vector<16x32xf32>
    %cst_27 = arith.constant 0.000000e+00 : f32
    %33 = vector.broadcast %cst_27 : f32 to vector<16x32xf32>
    %34 = arith.maximumf %32, %33 : vector<16x32xf32>
    %cst_28 = arith.constant dense<0.000000e+00> : vector<32x32xf32>
    %35 = tpu.matmul %1, %34, %cst_28 {dimension_numbers = #tpu.dot_dimension_numbers<[1], [0], [0], [1], [0, 0, 1, 1], [], []>} : vector<32x16xf32>, vector<16x32xf32>, vector<32x32xf32> -> vector<32x32xf32>
    %c1 = arith.constant 1 : index
    %c0_29 = arith.constant 0 : index
    %c0_30 = arith.constant 0 : index
    %36 = vector.load %arg3[%c1, %c0_29, %c0_30] : memref<2x32x32xf32, #tpu.memory_space<vmem>>, vector<1x32x32xf32>
    %37 = vector.shape_cast %36 : vector<1x32x32xf32> to vector<32x32xf32>
    %38 = arith.addf %35, %37 : vector<32x32xf32>
    %cst_31 = arith.constant 0.000000e+00 : f32
    %39 = vector.broadcast %cst_31 : f32 to vector<32x32xf32>
    %40 = arith.maximumf %38, %39 : vector<32x32xf32>
    %cst_32 = arith.constant dense<0.000000e+00> : vector<16x32xf32>
    %41 = tpu.matmul %3, %40, %cst_32 {dimension_numbers = #tpu.dot_dimension_numbers<[1], [0], [0], [1], [0, 0, 1, 1], [], []>} : vector<16x32xf32>, vector<32x32xf32>, vector<16x32xf32> -> vector<16x32xf32>
    %c1_33 = arith.constant 1 : index
    %42 = memref.load %arg8[%c1_33] : memref<2xf32, #tpu.memory_space<smem>>
    %cst_34 = arith.constant 1.000000e+00 : f32
    %43 = arith.addf %cst_34, %42 : f32
    %44 = vector.broadcast %43 : f32 to vector<16x32xf32>
    %45 = arith.mulf %44, %34 : vector<16x32xf32>
    %46 = arith.addf %45, %41 : vector<16x32xf32>
    %c1_35 = arith.constant 1 : index
    %c0_36 = arith.constant 0 : index
    %c0_37 = arith.constant 0 : index
    %47 = vector.load %arg4[%c1_35, %c0_36, %c0_37] : memref<2x32x32xf32, #tpu.memory_space<vmem>>, vector<1x32x32xf32>
    %48 = vector.shape_cast %47 : vector<1x32x32xf32> to vector<32x32xf32>
    %cst_38 = arith.constant dense<0.000000e+00> : vector<16x32xf32>
    %49 = tpu.matmul %46, %48, %cst_38 {dimension_numbers = #tpu.dot_dimension_numbers<[1], [0], [0], [1], [0, 0, 1, 1], [], []>} : vector<16x32xf32>, vector<32x32xf32>, vector<16x32xf32> -> vector<16x32xf32>
    %c1_39 = arith.constant 1 : index
    %c0_40 = arith.constant 0 : index
    %c0_41 = arith.constant 0 : index
    %50 = vector.load %arg5[%c1_39, %c0_40, %c0_41] : memref<2x1x32xf32, #tpu.memory_space<vmem>>, vector<1x1x32xf32>
    %51 = vector.shape_cast %50 : vector<1x1x32xf32> to vector<1x32xf32>
    %52 = vector.broadcast %51 : vector<1x32xf32> to vector<16x32xf32>
    %53 = arith.addf %49, %52 : vector<16x32xf32>
    %cst_42 = arith.constant 0.000000e+00 : f32
    %54 = vector.broadcast %cst_42 : f32 to vector<16x32xf32>
    %55 = arith.maximumf %53, %54 : vector<16x32xf32>
    %c1_43 = arith.constant 1 : index
    %c0_44 = arith.constant 0 : index
    %c0_45 = arith.constant 0 : index
    %56 = vector.load %arg6[%c1_43, %c0_44, %c0_45] : memref<2x32x32xf32, #tpu.memory_space<vmem>>, vector<1x32x32xf32>
    %57 = vector.shape_cast %56 : vector<1x32x32xf32> to vector<32x32xf32>
    %cst_46 = arith.constant dense<0.000000e+00> : vector<16x32xf32>
    %58 = tpu.matmul %55, %57, %cst_46 {dimension_numbers = #tpu.dot_dimension_numbers<[1], [0], [0], [1], [0, 0, 1, 1], [], []>} : vector<16x32xf32>, vector<32x32xf32>, vector<16x32xf32> -> vector<16x32xf32>
    %c1_47 = arith.constant 1 : index
    %c0_48 = arith.constant 0 : index
    %c0_49 = arith.constant 0 : index
    %59 = vector.load %arg7[%c1_47, %c0_48, %c0_49] : memref<2x1x32xf32, #tpu.memory_space<vmem>>, vector<1x1x32xf32>
    %60 = vector.shape_cast %59 : vector<1x1x32xf32> to vector<1x32xf32>
    %61 = vector.broadcast %60 : vector<1x32xf32> to vector<16x32xf32>
    %62 = arith.addf %58, %61 : vector<16x32xf32>
    %c0_50 = arith.constant 0 : index
    %c0_51 = arith.constant 0 : index
    %63 = vector.load %arg9[%c0_50, %c0_51] : memref<16x32xf32, #tpu.memory_space<vmem>>, vector<16x32xf32>
    tpu.vector_store %arg9[%c0_50, %c0_51], %62 {strides = array<i32>} : memref<16x32xf32, #tpu.memory_space<vmem>>, vector<16x32xf32>,
    return
  }
}

</mosaic_0001>

<bundles_post_ra>
// kernel: tpu_custom_call.1
= control target key start
LH: loop header
LB: loop body
LE: loop exit
PB: predicated region body
PF: predicated region fallthrough
CT: control target
= control target key end

     0   :  { %14 = vsyncpa [#allocation3], 0  ;;  %s1428_s0 = inlined_call_operand.vmem [shape: f32[16,32], index: 0, kind: input, shape index: {}]   ;;  %s1429_s1 = inlined_call_operand.vmem [shape: bf16[32,16], index: 1, kind: input, shape index: {}]   ;;  %s1430_s2 = inlined_call_operand.vmem [shape: bf16[16,32], index: 2, kind: input, shape index: {}]   ;;  %s1431_s3 = inlined_call_operand.hbm [shape: f32[2,32,32], index: 3, kind: input, shape index: {}]   ;;  %s1432_s4 = inlined_call_operand.hbm [shape: f32[2,32,32], index: 4, kind: input, shape index: {}]   ;;  %s1433_s5 = inlined_call_operand.vmem [shape: f32[2,1,32], index: 5, kind: input, shape index: {}]   ;;  %s1434_s6 = inlined_call_operand.hbm [shape: f32[2,32,32], index: 6, kind: input, shape index: {}]   ;;  %s1435_s7 = inlined_call_operand.vmem [shape: f32[2,1,32], index: 7, kind: input, shape index: {}]   ;;  %s1436_s8 = inlined_call_operand.vmem [shape: f32[2], index: 8, kind: input, shape index: {}]   ;;  %s1437_s9 = inlined_call_operand.hbm [shape: f32[16,32], index: 9, kind: output, shape index: {}]  }
   0x1   :  { %15 = vsyncpa [#allocation7], 0 }
   0x2   :  { %16 = vsyncpa [#allocation5], 0 }
   0x3   :  { %17 = vsyncpa [#allocation4], 0  ;;  %s1216_s30 = smov [#allocation6]   ;;  %s1217_s11 = smov [#allocation2]  }
   0x4   :  { %s41_s10 = sshll.u32 %s1216_s30, 4  ;;  %s29_s12 = sshll.u32 %s1217_s11, 4  ;;  %s42_s10 = int_to_ptr.vmem [resolvable:$true] %s41_s10  ;;  %s1273_s12 = int_to_ptr.vmem [resolvable:$true] %s29_s12 }
   0x5   :  { %s1108_s15 = scalar_lea.hbm %s1432_s4, 1024 }
   0x6   :  { %p1109_p0 = scmp.ne.s32.totalorder %s1432_s4, %s1108_s15  ;;  %p1112_p1 = scmp.lt.u32.totalorder %s1108_s15, %s1432_s4 }
   0x8   :  { %p1114_p2 = pnand %p1112_p1, %p1109_p0 }
   0xa   :  { %1117 = shalt.err (!%p1114_p2)
}
   0xb   :  { %s1118_s20 = scalar_lea.vmem %s42_s10, 1024  ;;  %p1123_p4 = scmp.lt.s32.totalorder %s42_s10, %s42_s10 }
   0xc   :  { %p1119_p3 = scmp.ne.s32.totalorder %s42_s10, %s1118_s20  ;;  %p1124_p5 = scmp.lt.s32.totalorder %s1118_s20, %s1118_s20 }
   0xe   :  { %p1125_p6 = por %p1124_p5, %p1123_p4 }
  0x10   :  { %p1126_p7 = pnand %p1125_p6, %p1119_p3 }
  0x12   :  { %1129 = shalt.err (!%p1126_p7)
}
  0x13   :  { %s1218_s21 = smov 128   ;;  %s1219_s22 = smov 8  }
  0x14   :  { %47 = dma.hbm_to_vmem [thread:$0]  %s1432_s4, 1024, %s42_s10, [#allocation7], %s1218_s21, %s1218_s21, %s1219_s22  }
  0x15   :  { %s1130_s27 = scalar_lea.hbm %s1431_s3, 1024 }
  0x16   :  { %p1131_p8 = scmp.ne.s32.totalorder %s1431_s3, %s1130_s27  ;;  %p1134_p9 = scmp.lt.u32.totalorder %s1130_s27, %s1431_s3 }
  0x18   :  { %p1136_p10 = pnand %p1134_p9, %p1131_p8 }
  0x1a   :  { %1139 = shalt.err (!%p1136_p10)
}
  0x1b   :  { %s1140_s13 = scalar_lea.vmem %s1273_s12, 1024  ;;  %p1145_p12 = scmp.lt.s32.totalorder %s1273_s12, %s1273_s12 }
  0x1c   :  { %p1141_p11 = scmp.ne.s32.totalorder %s1273_s12, %s1140_s13  ;;  %p1146_p13 = scmp.lt.s32.totalorder %s1140_s13, %s1140_s13 }
  0x1e   :  { %p1147_p0 = por %p1146_p13, %p1145_p12 }
  0x20   :  { %p1148_p1 = pnand %p1147_p0, %p1141_p11 }
  0x22   :  { %1151 = shalt.err (!%p1148_p1)
}
  0x23   :  { %35 = dma.hbm_to_vmem [thread:$0]  %s1431_s3, 1024, %s1273_s12, [#allocation3], %s1218_s21, %s1218_s21, %s1219_s22  }
  0x24   :  { %s70_s16 = sshll.u32 %s1436_s8, 4  ;;  %s1220_s17 = smov [#allocation8]   ;;  %s71_s16 = int_to_ptr.vmem [resolvable:$true] %s70_s16 }
  0x25   :  { %s55_s18 = sshll.u32 %s1220_s17, 4  ;;  %s1152_s23 = scalar_lea.hbm %s1434_s6, 1024  ;;  %s56_s18 = int_to_ptr.vmem [resolvable:$true] %s55_s18 }
  0x26   :  { %p1153_p2 = scmp.ne.s32.totalorder %s1434_s6, %s1152_s23  ;;  %p1156_p3 = scmp.lt.u32.totalorder %s1152_s23, %s1434_s6 }
  0x28   :  { %p1158_p4 = pnand %p1156_p3, %p1153_p2 }
  0x2a   :  { %1161 = shalt.err (!%p1158_p4)
}
  0x2b   :  { %s1162_s3 = scalar_lea.vmem %s56_s18, 1024  ;;  %p1167_p6 = scmp.lt.s32.totalorder %s56_s18, %s56_s18 }
  0x2c   :  { %p1163_p5 = scmp.ne.s32.totalorder %s56_s18, %s1162_s3  ;;  %p1168_p7 = scmp.lt.s32.totalorder %s1162_s3, %s1162_s3 }
  0x2e   :  { %p1169_p8 = por %p1168_p7, %p1167_p6 }
  0x30   :  { %p1170_p9 = pnand %p1169_p8, %p1163_p5 }
  0x32   :  { %1173 = shalt.err (!%p1170_p9)
}
  0x33   :  { %61 = dma.hbm_to_vmem [thread:$0]  %s1434_s6, 1024, %s56_s18, [#allocation7], %s1218_s21, %s1218_s21, %s1219_s22  }
  0x34   :  { %s1174_s28 = scalar_lea.vmem %s71_s16, 16  ;;  %p1179_p11 = scmp.lt.s32.totalorder %s71_s16, %s71_s16 }
  0x35   :  { %p1175_p10 = scmp.ne.s32.totalorder %s71_s16, %s1174_s28  ;;  %p1180_p12 = scmp.lt.s32.totalorder %s1174_s28, %s1174_s28 }
  0x37   :  { %p1181_p13 = por %p1180_p12, %p1179_p11 }
  0x39   :  { %p1182_p0 = pnand %p1181_p13, %p1175_p10 }
  0x3b   :  { %1185 = shalt.err (!%p1182_p0)
}
  0x3c   :  { %s1221_s29 = smov [#allocation9]  }
  0x3d   :  { %73 = dma.vmem_to_smem %s71_s16, 16, %s1221_s29, [#allocation5]  }
  0x3e   :  { %1208 = dma.done.wait [#allocation3], 1024  }
  0x3f   :  { %1209 = vsyncadd [#allocation3], 4294966272 }
  0x40   :  { %1210 = dma.done.wait [#allocation7], 2048  }
  0x41   :  { %1211 = vsyncadd [#allocation7], 4294965248 }
  0x42   :  { %1212 = dma.done.wait [#allocation5], 16  }
  0x43   :  { %1213 = vsyncadd [#allocation5], 4294967280 }
  0x44   :  { %86 = sfence }
  0x45   :  { %v99_v0 = vld [vmem:[%s1428_s0] sm:$0xff]  ;;  %v100_v1 = vld [vmem:[%s1428_s0 + $0x8] sm:$0xff]  ;;  %vm105_vm0 = vcmask 130048   ;;  %vm207_vm1 = vcmask 261120   ;;  %v104_v20 = vld [vmem:[#allocation2 + $0x18] sm:$0xff]  ;;  %s889_s23 = sld [smem:[#allocation9 + $0x1]] }
  0x46   :  { %v1337_v2 = vld [vmem:[%s1429_s1] sm:$0xff]   ;;  %v1045_v3 = vpack.c.bf16 %v100_v1, %v99_v0  ;;  %v1343_v5 = vld [vmem:[%s1429_s1 + $0x8] sm:$0xff]   ;;  %v103_v22 = vld [vmem:[#allocation2 + $0x10] sm:$0xff]  ;;  %s1222_s8 = smov [#allocation10]  }
  0x47   :  { %v900_v4 = vunpack.c.l.bf16 %v1337_v2  ;;  %v901_v6 = vunpack.c.h.bf16 %v1337_v2  ;;  %v904_v7 = vunpack.c.l.bf16 %v1343_v5  ;;  %v905_v8 = vunpack.c.h.bf16 %v1343_v5  ;;  %v1363_v9 = vld [vmem:[%s1430_s2] sm:$0xff]   ;;  %v297_v12 = vld [vmem:[#allocation6 + $0x8] sm:$0xff]  ;;  %v298_v33 = vld [vmem:[#allocation6 + $0x10] sm:$0xff]  ;;  %s289_s2 = sld [smem:[#allocation9]]  ;;  %s857_s12 = sshll.u32 %s1222_s8, 4  ;;  %s858_s12 = int_to_ptr.vmem [resolvable:$true] %s857_s12 }
  0x48   :  { %1046 = vmatprep.subr.bf16.mxu1 %v1045_v3  ;;  %v908_v10 = vunpack.c.l.bf16 %v1363_v9  ;;  %v296_v11 = vld [vmem:[#allocation6] sm:$0xff]  ;;  %v102_v14 = vld [vmem:[#allocation2 + $0x8] sm:$0xff]  ;;  %v909_v32 = vunpack.c.h.bf16 %v1363_v9  ;;  %v299_v34 = vld [vmem:[#allocation6 + $0x18] sm:$0xff]  ;;  %p1191_p2 = scmp.lt.s32.totalorder %s858_s12, %s858_s12 }
  0x49   :  { %963 = vmatprep.mubr.msk.f32.mxu1 %vm105_vm0, %v900_v4  ;;  %1048 = vmatpush3.bf16.msra.mxu1 %v1045_v3  ;;  %v1057_v13 = vpack.c.bf16 %v297_v12, %v296_v11  ;;  %v101_v15 = vld [vmem:[#allocation2] sm:$0xff]  ;;  %v1061_v35 = vpack.c.bf16 %v299_v34, %v298_v33  ;;  %v391_v37 = vld [vmem:[#allocation8 + $0x8] sm:$0xff]  ;;  %v392_v46 = vld [vmem:[#allocation8 + $0x10] sm:$0xff] }
  0x4a   :  { %v390_v36 = vld [vmem:[#allocation8] sm:$0xff]  ;;  %v393_v47 = vld [vmem:[#allocation8 + $0x18] sm:$0xff]  ;;  %v486_v2 = vld [vmem:[#allocation2 + $0x28] sm:$0xff] }
  0x4b   :  { %1058 = vmatprep.subr.bf16.mxu0 %v1057_v13  ;;  %v1065_v38 = vpack.c.bf16 %v391_v37, %v390_v36  ;;  %v1069_v48 = vpack.c.bf16 %v393_v47, %v392_v46  ;;  %v877_v49 = vld [vmem:[%s1433_s5] ss:$0 sm:$0xff]  ;;  %v487_v5 = vld [vmem:[#allocation2 + $0x30] sm:$0xff]  ;;  %s654_s24 = sadd.f32 1.0, %s889_s23  ;;  %v891_v37 = vld [vmem:[%s1433_s5 + $0x1] ss:$0 sm:$0xff] }
  0x4c   :  { %964 = vmatmul.mubr.msk.f32.vlgmr.msra.gmra.mrb[0].mxu1 %vm105_vm0, %v901_v6  ;;  %1060 = vmatpush3.bf16.msra.mxu0 %v1057_v13  ;;  %v880_v56 = vld [vmem:[%s1435_s7] ss:$0 sm:$0xff]  ;;  %s1186_s5 = scalar_lea.vmem %s858_s12, 256 }
  0x4d   :  { %966 = vmatprep.mubr.msk.f32.mxu1 %vm105_vm0, %v904_v7  ;;  %1062 = vmatprep.subr.bf16.mxu0 %v1061_v35  ;;  %s290_s16 = sadd.f32 1.0, %s289_s2  ;;  %p1187_p1 = scmp.ne.s32.totalorder %s858_s12, %s1186_s5 }
  0x4e   :  { %p1192_p3 = scmp.lt.s32.totalorder %s1186_s5, %s1186_s5 }
  0x4f   :  { %v291_v39 = vstv %s290_s16 }
  0x50   :  { %967 = vmatmul.mubr.msk.f32.gmra.mrb[2].mxu1 %vm105_vm0, %v905_v8  ;;  %1064 = vmatpush3.bf16.msra.mxu0 %v1061_v35  ;;  %v292_v40 = vmul.f32 %v291_v39, %v99_v0  ;;  %v293_v41 = vmul.f32 %v291_v39, %v100_v1  ;;  %v661_v0 = vld [vmem:[#allocation6 + $0x20] sm:$0xff]  ;;  %v662_v1 = vld [vmem:[#allocation6 + $0x28] sm:$0xff]  ;;  %v760_v35 = vld [vmem:[#allocation8 + $0x38] sm:$0xff]  ;;  %p1193_p4 = por %p1192_p3, %p1191_p2 }
  0x51   :  { %977 = vmatprep.mubr.msk.f32.mxu1 %vm207_vm1, %v908_v10  ;;  %v1085_v3 = vpack.c.bf16 %v662_v1, %v661_v0 }
  0x52   :  { %p1194_p5 = pnand %p1193_p4, %p1187_p1 }
 0x11f   :  { %v965_v16 = vpop.f32.mrb[0].mxu1 }
 0x120   :  { %v190_v17 = vadd.f32 %v965_v16, %v102_v14  ;;  %v184_v18 = vpop.f32.mrb[1].mxu1 }
 0x121   :  { %v185_v19 = vadd.f32 %v184_v18, %v101_v15 }
 0x122   :  { %v204_v21 = vmax.f32 %v190_v17, 0.0 }
 0x123   :  { %v203_v23 = vmax.f32 %v185_v19, 0.0  ;;  %v968_v24 = vpop.f32.mrb[2].mxu1 }
 0x124   :  { %v200_v25 = vadd.f32 %v968_v24, %v104_v20  ;;  %v194_v26 = vpop.f32.mrb[3].mxu1 }
 0x125   :  { %v1049_v27 = vpack.c.bf16 %v204_v21, %v203_v23  ;;  %v195_v28 = vadd.f32 %v194_v26, %v103_v22  ;;  %v663_v22 = vld [vmem:[#allocation6 + $0x30] sm:$0xff]  ;;  %v664_v23 = vld [vmem:[#allocation6 + $0x38] sm:$0xff]  ;;  %v758_v26 = vld [vmem:[#allocation8 + $0x28] sm:$0xff] }
 0x126   :  { %v206_v29 = vmax.f32 %v200_v25, 0.0  ;;  %v1089_v24 = vpack.c.bf16 %v664_v23, %v663_v22  ;;  %v757_v25 = vld [vmem:[#allocation8 + $0x20] sm:$0xff] }
 0x127   :  { %v205_v30 = vmax.f32 %v195_v28, 0.0  ;;  %1050 = vmatprep.subr.bf16.mxu1 %v1049_v27  ;;  %v655_v28 = vstv %s654_s24 }
 0x128   :  { %1052 = vmatpush3.bf16.msra.mxu1 %v1049_v27  ;;  %v1093_v27 = vpack.c.bf16 %v758_v26, %v757_v25 }
 0x129   :  { %v1053_v31 = vpack.c.bf16 %v206_v29, %v205_v30 }
 0x12b   :  { %1054 = vmatprep.subr.bf16.mxu1 %v1053_v31 }
 0x12c   :  { %1056 = vmatpush3.bf16.msra.mxu1 %v1053_v31 }
 0x12d   :  { %1066 = vmatprep.subr.bf16.mxu1 %v1065_v38 }
 0x12f   :  { %978 = vmatmul.mubr.msk.f32.vlgmr.msra.gmra.mrb[4].mxu1 %vm207_vm1, %v909_v32 }
 0x130   :  { %1068 = vmatpush3.bf16.msra.mxu1 %v1065_v38 }
 0x131   :  { %1070 = vmatprep.subr.bf16.mxu1 %v1069_v48 }
 0x134   :  { %1072 = vmatpush3.bf16.msra.mxu1 %v1069_v48 }
 0x135   :  { %1086 = vmatprep.subr.bf16.mxu1 %v1085_v3 }
 0x202   :  { %v979_v42 = vpop.f32.mrb[4].mxu1 }
 0x203   :  { %v280_v43 = vpop.f32.mrb[5].mxu1  ;;  %v295_v45 = vadd.f32 %v979_v42, %v293_v41 }
 0x204   :  { %v294_v44 = vadd.f32 %v292_v40, %v280_v43 }
 0x206   :  { %988 = vmatprep.mubr.msk.f32.mxu0 %vm207_vm1, %v294_v44  ;;  %v895_v44 = vld [vmem:[%s1435_s7 + $0x1] ss:$0 sm:$0xff] }
 0x207   :  { %989 = vmatmul.mubr.msk.f32.vlgmr.msra.gmra.mrb[0].mxu0 %vm207_vm1, %v295_v45 }
 0x208   :  { %1006 = vmatprep.mubr.msk.f32.mxu0 %vm105_vm0, %v900_v4  ;;  %v485_v4 = vld [vmem:[#allocation2 + $0x20] sm:$0xff] }
 0x2da   :  { %v990_v50 = vpop.f32.mrb[0].mxu0 }
 0x2db   :  { %v385_v51 = vadd.f32 %v990_v50, %v877_v49  ;;  %v379_v52 = vpop.f32.mrb[1].mxu0 }
 0x2dc   :  { %v380_v53 = vadd.f32 %v877_v49, %v379_v52 }
 0x2dd   :  { %v389_v55 = vmax.f32 %v385_v51, 0.0 }
 0x2de   :  { %v388_v54 = vmax.f32 %v380_v53, 0.0 }
 0x2e0   :  { %999 = vmatprep.mubr.msk.f32.mxu1 %vm207_vm1, %v388_v54 }
 0x2e1   :  { %1000 = vmatmul.mubr.msk.f32.vlgmr.msra.gmra.mrb[6].mxu1 %vm207_vm1, %v389_v55 }
 0x2e2   :  { %1088 = vmatpush3.bf16.msra.mxu1 %v1085_v3 }
 0x2e3   :  { %1090 = vmatprep.subr.bf16.mxu1 %v1089_v24 }
 0x2e6   :  { %1092 = vmatpush3.bf16.msra.mxu1 %v1089_v24 }
 0x3b4   :  { %v1001_v57 = vpop.f32.mrb[6].mxu1 }
 0x3b5   :  { %v479_v58 = vadd.f32 %v1001_v57, %v880_v56  ;;  %v473_v59 = vpop.f32.mrb[7].mxu1 }
 0x3b6   :  { %v474_v60 = vadd.f32 %v880_v56, %v473_v59 }
 0x3b7   :  { %v483_v61 = vmax.f32 %v479_v58, 0.0 }
 0x3b8   :  { %v482_v62 = vmax.f32 %v474_v60, 0.0 }
 0x3b9   :  { %v657_v29 = vmul.f32 %v655_v28, %v483_v61 }
 0x3ba   :  { %v1073_v63 = vpack.c.bf16 %v483_v61, %v482_v62  ;;  %v656_v31 = vmul.f32 %v655_v28, %v482_v62 }
 0x3bc   :  { %1074 = vmatprep.subr.bf16.mxu0 %v1073_v63 }
 0x3bd   :  { %1076 = vmatpush3.bf16.msra.mxu0 %v1073_v63 }
 0x3c0   :  { %1007 = vmatmul.mubr.msk.f32.vlgmr.msra.gmra.mrb[2].mxu0 %vm105_vm0, %v901_v6 }
 0x3c1   :  { %1009 = vmatprep.mubr.msk.f32.mxu0 %vm105_vm0, %v904_v7  ;;  %v488_v7 = vld [vmem:[#allocation2 + $0x38] sm:$0xff] }
 0x3c4   :  { %1010 = vmatmul.mubr.msk.f32.gmra.mrb[4].mxu0 %vm105_vm0, %v905_v8 }
 0x3c5   :  { %1020 = vmatprep.mubr.msk.f32.mxu0 %vm207_vm1, %v908_v10 }
 0x493   :  { %v1008_v6 = vpop.f32.mrb[2].mxu0 }
 0x494   :  { %v561_v11 = vadd.f32 %v1008_v6, %v486_v2  ;;  %v555_v12 = vpop.f32.mrb[3].mxu0 }
 0x495   :  { %v556_v13 = vadd.f32 %v555_v12, %v485_v4 }
 0x496   :  { %v575_v14 = vmax.f32 %v561_v11, 0.0 }
 0x497   :  { %v574_v15 = vmax.f32 %v556_v13, 0.0  ;;  %v1011_v8 = vpop.f32.mrb[4].mxu0 }
 0x498   :  { %v571_v16 = vadd.f32 %v1011_v8, %v488_v7  ;;  %v565_v17 = vpop.f32.mrb[5].mxu0 }
 0x499   :  { %v1077_v18 = vpack.c.bf16 %v575_v14, %v574_v15  ;;  %v566_v10 = vadd.f32 %v565_v17, %v487_v5 }
 0x49a   :  { %v577_v19 = vmax.f32 %v571_v16, 0.0 }
 0x49b   :  { %v576_v20 = vmax.f32 %v566_v10, 0.0  ;;  %1078 = vmatprep.subr.bf16.mxu0 %v1077_v18 }
 0x49c   :  { %1080 = vmatpush3.bf16.msra.mxu0 %v1077_v18 }
 0x49d   :  { %v1081_v21 = vpack.c.bf16 %v577_v19, %v576_v20 }
 0x49f   :  { %1082 = vmatprep.subr.bf16.mxu0 %v1081_v21 }
 0x4a0   :  { %1084 = vmatpush3.bf16.msra.mxu0 %v1081_v21 }
 0x4a1   :  { %1094 = vmatprep.subr.bf16.mxu0 %v1093_v27 }
 0x4a3   :  { %1021 = vmatmul.mubr.msk.f32.vlgmr.msra.gmra.mrb[6].mxu0 %vm207_vm1, %v909_v32  ;;  %v759_v32 = vld [vmem:[#allocation8 + $0x30] sm:$0xff] }
 0x4a4   :  { %1096 = vmatpush3.bf16.msra.mxu0 %v1093_v27  ;;  %v1097_v36 = vpack.c.bf16 %v760_v35, %v759_v32 }
 0x4a6   :  { %1098 = vmatprep.subr.bf16.mxu0 %v1097_v36 }
 0x4a8   :  { %1100 = vmatpush3.bf16.msra.mxu0 %v1097_v36 }
 0x576   :  { %v1022_v30 = vpop.f32.mrb[6].mxu0 }
 0x577   :  { %v659_v33 = vadd.f32 %v1022_v30, %v657_v29  ;;  %v644_v9 = vpop.f32.mrb[7].mxu0 }
 0x578   :  { %v658_v34 = vadd.f32 %v656_v31, %v644_v9 }
 0x57a   :  { %1031 = vmatprep.mubr.msk.f32.mxu1 %vm207_vm1, %v658_v34 }
 0x57b   :  { %1032 = vmatmul.mubr.msk.f32.vlgmr.msra.gmra.mrb[8].mxu1 %vm207_vm1, %v659_v33 }
 0x64e   :  { %v1033_v38 = vpop.f32.mrb[8].mxu1 }
 0x64f   :  { %v751_v39 = vadd.f32 %v1033_v38, %v891_v37  ;;  %v745_v40 = vpop.f32.mrb[9].mxu1 }
 0x650   :  { %v746_v41 = vadd.f32 %v891_v37, %v745_v40 }
 0x651   :  { %v755_v43 = vmax.f32 %v751_v39, 0.0 }
 0x652   :  { %v754_v42 = vmax.f32 %v746_v41, 0.0 }
 0x654   :  { %1042 = vmatprep.mubr.msk.f32.mxu0 %vm207_vm1, %v754_v42 }
 0x655   :  { %1043 = vmatmul.mubr.msk.f32.vlgmr.msra.gmra.mrb[8].mxu0 %vm207_vm1, %v755_v43 }
 0x728   :  { %v1044_v45 = vpop.f32.mrb[8].mxu0 }
 0x729   :  { %v847_v46 = vadd.f32 %v1044_v45, %v895_v44  ;;  %v841_v47 = vpop.f32.mrb[9].mxu0 }
 0x72a   :  { %v842_v48 = vadd.f32 %v895_v44, %v841_v47 }
 0x72b   :  { %851 = vst.msk [vmem:[#allocation10 + $0x8] sm:$0xff] %vm207_vm1, %v847_v46 }
 0x72c   :  { %850 = vst.msk [vmem:[#allocation10] sm:$0xff] %vm207_vm1, %v842_v48 }
 0x72d   :  { %1197 = shalt.err (!%p1194_p5)
}
 0x72e   :  { %s1198_s29 = scalar_lea.hbm %s1437_s9, 256 }
 0x72f   :  { %p1199_p6 = scmp.ne.s32.totalorder %s1437_s9, %s1198_s29  ;;  %p1202_p7 = scmp.lt.u32.totalorder %s1198_s29, %s1437_s9 }
 0x731   :  { %p1204_p8 = pnand %p1202_p7, %p1199_p6 }
 0x733   :  { %1207 = shalt.err (!%p1204_p8)
}
 0x734   :  { %863 = dma.vmem_to_hbm [thread:$0]  %s858_s12, 256, %s1437_s9, [#allocation4], %s1218_s21, %s1218_s21, %s1219_s22  }
 0x735   :  { %1214 = dma.done.wait [#allocation4], 256  }
 0x736   :  { %1215 = vsyncadd [#allocation4], 4294967040 }
 0x737   :  { %867 = vsyncpa [#allocation3], 1 }
 0x738   :  { %868 = vsyncpa [#allocation7], 1 }
 0x739   :  { %869 = vsyncpa [#allocation4], 1 }
 0x73a   :  { %870 = vsyncpa [#allocation5], 1 }

</bundles_post_ra>
